<compile_context>
chip_gen: v6e
topology: v6e:2x2x1
jax: 0.10.0
libtpu: 0.0.40
codegen_flags: <defaults>
</compile_context>

<pallas_src>
import jax
import jax.numpy as jnp
from jax.experimental import pallas as pl
from jax.experimental.pallas import tpu as pltpu

EPS = 1e-5


def _layernorm_kernel_nobias(x_ref, w_ref, o_ref):
    # x_ref: (TR, H) tile of rows; w_ref: (1, H); o_ref: (TR, H)
    x = x_ref[...].astype(jnp.float32)
    h = x.shape[-1]
    mean = jnp.sum(x, axis=-1, keepdims=True) * (1.0 / h)
    xc = x - mean
    var = jnp.sum(xc * xc, axis=-1, keepdims=True) * (1.0 / h)  # biased (PyTorch)
    inv = jax.lax.rsqrt(var + EPS)
    y = (xc * inv) * w_ref[...].astype(jnp.float32)
    o_ref[...] = y.astype(o_ref.dtype)


def _layernorm_kernel_bias(x_ref, w_ref, b_ref, o_ref):
    x = x_ref[...].astype(jnp.float32)
    h = x.shape[-1]
    mean = jnp.sum(x, axis=-1, keepdims=True) * (1.0 / h)
    xc = x - mean
    var = jnp.sum(xc * xc, axis=-1, keepdims=True) * (1.0 / h)
    inv = jax.lax.rsqrt(var + EPS)
    y = (xc * inv) * w_ref[...].astype(jnp.float32) + b_ref[...].astype(jnp.float32)
    o_ref[...] = y.astype(o_ref.dtype)


def _vmem_budget():
    """(physical_vmem, usable_budget) — generation-aware, with safe fallback."""
    cap = 64 << 20  # conservative fallback (v7x per-TC VMEM)
    try:
        info = pltpu.get_tpu_info()
        cap = int(getattr(info, "vmem_capacity_bytes", cap)) or cap
    except Exception:
        pass
    # Leave headroom below physical for Mosaic internal scratch / semaphores;
    # never request more than ~96 MiB even on 128 MiB-VMEM chips.
    usable = min(max(cap - (12 << 20), 16 << 20), 96 << 20)
    return cap, usable


def _choose_tile_rows(n_rows, h, itemsize, usable_vmem):
    """Row tile: big enough to amortize ~0.35us/step pipeline overhead, small
    enough for the per-generation VMEM budget, multiple of the dtype's sublane
    packing, and leaving >= 2 grid steps so DMA/compute overlap."""
    if itemsize >= 4:
        min_rows = 8
    elif itemsize == 2:
        min_rows = 16
    else:
        min_rows = 32

    if n_rows <= min_rows:
        # Single block covering the whole (tiny) row axis.
        return n_rows

    # Resident bytes per input-tile byte: 2x double-buffered input + 2x output
    # (= 4 streams) plus ~3 f32-sized temporaries inside the kernel.
    resident_factor = 4.0 + 3.0 * (4.0 / itemsize)
    target_tile_bytes = int(usable_vmem / resident_factor)
    target_tile_bytes = max(1 << 20, min(target_tile_bytes, 16 << 20))

    rows = max(min_rows, target_tile_bytes // max(h * itemsize, 1))
    rows = min(rows, 4096)
    rows = max(min_rows, (rows // min_rows) * min_rows)

    # Don't exceed the (rounded-up) problem size.
    rows = min(rows, max(min_rows, pl.cdiv(n_rows, min_rows) * min_rows))

    # Keep at least 2 grid steps (DMA/compute overlap); relaxed from 4.
    while rows > min_rows and pl.cdiv(n_rows, rows) < 2:
        rows = max(min_rows, ((rows // 2) // min_rows) * min_rows)
    return rows


def layer_norm(x, weight, bias=None):
    """x: (..., H). weight: (H,). bias: (H,) or None. Same shape/dtype as x."""
    orig_shape = x.shape
    H = orig_shape[-1]
    x2 = x.reshape(-1, H)
    R = x2.shape[0]

    itemsize = jnp.dtype(x.dtype).itemsize
    vmem_cap, usable_vmem = _vmem_budget()
    tile_rows = _choose_tile_rows(R, H, itemsize, usable_vmem)

    # No padding: Pallas handles the trailing partial block (masked stores).
    grid_rows = pl.cdiv(R, tile_rows)

    w2 = weight.reshape(1, H)

    # VMEM limit sized from the actual tile, capped generation-aware.
    tile_bytes = tile_rows * H * itemsize
    f32_tile_bytes = tile_rows * H * 4
    vmem_limit = 4 * tile_bytes + 3 * f32_tile_bytes + (2 << 20)
    vmem_limit = max(vmem_limit, 16 << 20)
    vmem_limit = min(vmem_limit, max(vmem_cap - (12 << 20), 16 << 20), 96 << 20)

    cost = pl.CostEstimate(
        flops=int(8 * R * H),
        transcendentals=int(R),
        bytes_accessed=int(2 * R * H * itemsize + 2 * H * 4),
    )

    x_spec = pl.BlockSpec((tile_rows, H), lambda i: (i, 0))
    p_spec = pl.BlockSpec((1, H), lambda i: (0, 0))
    o_spec = pl.BlockSpec((tile_rows, H), lambda i: (i, 0))

    if bias is None:
        kernel = _layernorm_kernel_nobias
        in_specs = [x_spec, p_spec]
        operands = (x2, w2)
    else:
        kernel = _layernorm_kernel_bias
        in_specs = [x_spec, p_spec, p_spec]
        operands = (x2, w2, bias.reshape(1, H))

    out = pl.pallas_call(
        kernel,
        out_shape=jax.ShapeDtypeStruct((R, H), x.dtype),
        grid_spec=pltpu.PrefetchScalarGridSpec(
            num_scalar_prefetch=0,
            grid=(grid_rows,),
            in_specs=in_specs,
            out_specs=o_spec,
        ),
        compiler_params=pltpu.CompilerParams(
            dimension_semantics=("parallel",),
            vmem_limit_bytes=int(vmem_limit),
        ),
        cost_estimate=cost,
    )(*operands)

    return out.reshape(orig_shape)


if __name__ == "__main__":
    key = jax.random.PRNGKey(0)
    B, S, H = 2, 8, 32

    # Deterministic parameter init, matching the nn.Module __init__:
    # weight = ones(H), bias = None (bias=False default)
    weight = jnp.ones((H,), dtype=jnp.float32)
    bias = None

    x = jax.random.normal(key, (B, S, H), dtype=jnp.float32)

    y = layer_norm(x, weight, bias)
    y = jax.block_until_ready(y)

    # Reference check against plain-JAX layer norm (biased variance, eps=1e-5)
    mean = jnp.mean(x, axis=-1, keepdims=True)
    var = jnp.mean((x - mean) ** 2, axis=-1, keepdims=True)
    ref = (x - mean) * jax.lax.rsqrt(var + EPS) * weight
    assert jnp.allclose(y, ref, atol=1e-5, rtol=1e-5)

    print("KERNEL_OK")
</pallas_src>

<mosaic_0001>
module attributes {stable_mosaic.version = 11 : i64} {
  func.func @_layernorm_kernel_nobias(%arg0: i32, %arg1: memref<8x32xf32, #tpu.memory_space<vmem>>, %arg2: memref<1x32xf32, #tpu.memory_space<vmem>>, %arg3: memref<8x32xf32, #tpu.memory_space<vmem>>) attributes {dimension_semantics = [#tpu.dimension_semantics<parallel>], iteration_bounds = array<i64: 2>, scalar_prefetch = 0 : i64, scratch_operands = 0 : i64, tpu.core_type = #tpu.core_type<tc>, window_params = [{transform_indices = @transform_0, window_bounds = array<i64: 8, 32>}, {pipeline_mode = #tpu.pipeline_mode<synchronous>, transform_indices = @transform_1, window_bounds = array<i64: 1, 32>}, {transform_indices = @transform_2, window_bounds = array<i64: 8, 32>}]} {
    %c0 = arith.constant 0 : index
    %c0_0 = arith.constant 0 : index
    %0 = vector.load %arg1[%c0, %c0_0] : memref<8x32xf32, #tpu.memory_space<vmem>>, vector<8x32xf32>
    %cst = arith.constant dense<0.000000e+00> : vector<8xf32>
    %1 = vector.multi_reduction <add>, %0, %cst [1] : vector<8x32xf32> to vector<8xf32>
    %2 = vector.shape_cast %1 : vector<8xf32> to vector<8x1xf32>
    %cst_1 = arith.constant 3.125000e-02 : f32
    %3 = vector.broadcast %cst_1 : f32 to vector<8x1xf32>
    %4 = arith.mulf %2, %3 : vector<8x1xf32>
    %5 = vector.broadcast %4 : vector<8x1xf32> to vector<8x32xf32>
    %6 = arith.subf %0, %5 : vector<8x32xf32>
    %7 = arith.mulf %6, %6 : vector<8x32xf32>
    %cst_2 = arith.constant dense<0.000000e+00> : vector<8xf32>
    %8 = vector.multi_reduction <add>, %7, %cst_2 [1] : vector<8x32xf32> to vector<8xf32>
    %9 = vector.shape_cast %8 : vector<8xf32> to vector<8x1xf32>
    %cst_3 = arith.constant 3.125000e-02 : f32
    %10 = vector.broadcast %cst_3 : f32 to vector<8x1xf32>
    %11 = arith.mulf %9, %10 : vector<8x1xf32>
    %cst_4 = arith.constant 9.99999974E-6 : f32
    %12 = vector.broadcast %cst_4 : f32 to vector<8x1xf32>
    %13 = arith.addf %11, %12 : vector<8x1xf32>
    %14 = math.rsqrt %13 : vector<8x1xf32>
    %15 = vector.broadcast %14 : vector<8x1xf32> to vector<8x32xf32>
    %16 = arith.mulf %6, %15 : vector<8x32xf32>
    %c0_5 = arith.constant 0 : index
    %c0_6 = arith.constant 0 : index
    %17 = vector.load %arg2[%c0_5, %c0_6] : memref<1x32xf32, #tpu.memory_space<vmem>>, vector<1x32xf32>
    %18 = vector.broadcast %17 : vector<1x32xf32> to vector<8x32xf32>
    %19 = arith.mulf %16, %18 : vector<8x32xf32>
    %c0_7 = arith.constant 0 : index
    %c0_8 = arith.constant 0 : index
    %20 = vector.load %arg3[%c0_7, %c0_8] : memref<8x32xf32, #tpu.memory_space<vmem>>, vector<8x32xf32>
    tpu.vector_store %arg3[%c0_7, %c0_8], %19 {strides = array<i32>} : memref<8x32xf32, #tpu.memory_space<vmem>>, vector<8x32xf32>,
    return
  }
  func.func @transform_0(%arg0: i32) -> (i32, i32) {
    %c0_i32 = arith.constant 0 : i32
    %c0_i32_0 = arith.constant 0 : i32
    return %arg0, %c0_i32 : i32, i32
  }
  func.func @transform_1(%arg0: i32) -> (i32, i32) {
    %c0_i32 = arith.constant 0 : i32
    %c0_i32_0 = arith.constant 0 : i32
    %c0_i32_1 = arith.constant 0 : i32
    return %c0_i32, %c0_i32_0 : i32, i32
  }
  func.func @transform_2(%arg0: i32) -> (i32, i32) {
    %c0_i32 = arith.constant 0 : i32
    %c0_i32_0 = arith.constant 0 : i32
    return %arg0, %c0_i32 : i32, i32
  }
}

</mosaic_0001>

<bundles_post_ra>
// kernel: tpu_custom_call.1
= control target key start
LH: loop header
LB: loop body
LE: loop exit
PB: predicated region body
PF: predicated region fallthrough
CT: control target
= control target key end

     0   :  { %7 = vsyncpa [#allocation3], 0  ;;  %s586_s0 = inlined_call_operand.hbm [shape: f32[16,32], index: 0, kind: input, shape index: {}]   ;;  %s587_s1 = inlined_call_operand.vmem [shape: f32[1,32], index: 1, kind: input, shape index: {}]   ;;  %s588_s2 = inlined_call_operand.hbm [shape: f32[16,32], index: 2, kind: output, shape index: {}]  }
   0x1   :  { %9 = vsyncpa [#allocation3 + $0x1], 0 }
   0x2   :  { %10 = vsyncpa [#allocation4], 0 }
   0x3   :  { %12 = vsyncpa [#allocation4 + $0x1], 0  ;;  %s439_s9 = smov 0   ;;  %s441_s10 = smov 0  }
   0x4   :  { %s443_s11 = smov 0   ;;  %s445_s12 = smov 0  }
   0x5 LB: > { %s460_s13 = sadd.s32 4294967295, %s420_s12   ;;  %s267_s14 = sadd.s32 4294967294, %s420_s12   ;;  %s420_s12 = sphi %s445_s12, %s605_s12   ;;  %s416_s11 = sphi %s443_s11, %s604_s11   ;;  %s412_s10 = sphi %s441_s10, %s603_s10   ;;  %s408_s9 = sphi %s439_s9, %s602_s9  }
   0x6   : > { %s464_s15 = sadd.s32 1, %s420_s12   ;;  %s25_s16 = sadd.s32 1, %s416_s11 }
   0x7   : > { %s22_s17 = ssub.s32 %s420_s12, %s464_s15  ;;  %p32_p0 = scmp.ne.s32.totalorder %s416_s11, %s412_s10 }
   0x8   : > { %p23_p1 = scmp.eq.s32.totalorder %s22_s17, 0  ;;  %p33_p2 = scmp.eq.s32.totalorder %s420_s12, 0 }
   0x9   : > { %p38_p3 = scmp.ne.s32.totalorder %s412_s10, %s408_s9  ;;  %p39_p4 = scmp.eq.s32.totalorder %s460_s13, 0 }
   0xa   : > { %s476_s18 = scalar_select %p23_p1, %s416_s11, %s25_s16  }
   0xb   : > { %p478_p5 = por %p33_p2, %p32_p0  ;;  %p482_p6 = por %p39_p4, %p38_p3 }
   0xc   : > { %p83_p7 = scmp.eq.s32.totalorder %s460_s13, 1  ;;  %p89_p8 = scmp.eq.s32.totalorder %s267_s14, 1 }
   0xd   : > { %s592_s20 = scalar_select %p482_p6, 1, 0 }
   0xe   : > { %p292_p10 = scmp.lt.s32.totalorder %s420_s12, 2  ;;  %p489_p11 = por %p83_p7, %p32_p0 }
   0xf   : > { %p493_p12 = por %p89_p8, %p38_p3  ;;  %s112_s23 = sand.u32 1, %s416_s11  }
  0x10   : > { %s593_s21 = scalar_select %p489_p11, 1, 0 }
  0x11   : > { %s594_s22 = scalar_select %p493_p12, 1, 0 }
  0x12   : > { %s271_s24 = sshll.u32 %s420_s12, 7  ;;  %s270_s25 = sshll.u32 %s112_s23, 3 }
  0x13   : > { %s502_s28 = scalar_lea.hbm %s586_s0, %s271_s24  ;;  %s116_s29 = scalar_lea.vmem [#allocation2], %s270_s25 }
  0x14   : > { %s123_s30 = sshll.u32 %s116_s29, 4  ;;  %p506_p13 = pnand %p292_p10, %p478_p5  ;;  %s510_s30 = int_to_ptr.vmem [resolvable:$true] %s123_s30 }
  0x15   : > { %s113_s4 = scalar_lea.sflag [#allocation3], %s112_s23  ;;  %s328_s5 = scalar_lea.hbm %s502_s28, 128 }
  0x16   : > { %p329_p2 = scmp.ne.s32.totalorder %s502_s28, %s328_s5  ;;  %p330_p3 = pneg %p506_p13 }
  0x17   : > { %s333_s8 = scalar_lea.hbm %s586_s0, 256  ;;  %p334_p5 = scmp.lt.s32.totalorder %s502_s28, %s586_s0 }
  0x18   : > { %p331_p4 = pnand %p330_p3, %p329_p2  ;;  %p335_p8 = scmp.lt.s32.totalorder %s333_s8, %s328_s5 }
  0x1a   : > { %p332_p7 = pneg %p331_p4  ;;  %p336_p10 = por %p335_p8, %p334_p5 }
  0x1c   : > { %p337_p9 = pnand %p336_p10, %p332_p7 }
  0x1e   : > { %340 = shalt.err (!%p337_p9)
}
  0x1f   : > { %s341_s17 = scalar_lea.vmem %s510_s30, 128  ;;  %s422_s19 = smov [#allocation2]  }
  0x20   : > { %p342_p0 = scmp.ne.s32.totalorder %s510_s30, %s341_s17  ;;  %s346_s23 = sshll.u32 %s422_s19, 4  ;;  %s347_s23 = int_to_ptr.vmem [resolvable:$false] %s346_s23 }
  0x21   : > { %s348_s24 = scalar_lea.vmem %s347_s23, 256  ;;  %p349_p4 = scmp.lt.s32.totalorder %s510_s30, %s347_s23 }
  0x22   : > { %p344_p1 = pnand %p342_p0, %p330_p3  ;;  %p350_p12 = scmp.lt.s32.totalorder %s348_s24, %s341_s17 }
  0x24   : > { %p345_p2 = pneg %p344_p1  ;;  %p351_p11 = por %p350_p12, %p349_p4 }
  0x26   : > { %p352_p6 = pnand %p351_p11, %p345_p2 }
  0x28   : > { %355 = shalt.err (!%p352_p6)
}
  0x29   : > { %287 = dma.hbm_to_vmem [thread:$0]  (!%p506_p13), %s502_s28, 128, %s510_s30, %s113_s4  }
  0x2a   : > { %p596_p9 = scmp.lt.s32.totalorder %s420_s12, 3  ;;  %p597_p7 = scmp.ge.s32.totalorder %s420_s12, 1 }
  0x2c   : > { %p129_p0 = pnand %p597_p7, %p596_p9 }
  0x2d   : > { %s537_s25 = sand.u32 (!%p129_p0), 1, %s412_s10   ;;  %p598_p6 = scmp.ne.s32.totalorder (!%p129_p0), %s592_s20, 0 }
  0x2e   : > { %132 = sbr.rel (%p129_p0) target bundleno = 372 (0x174), region = 28  ;;  %s273_s26 = sshll.u32 (!%p129_p0), %s537_s25, 3 }
  0x2f   : > { %s135_s27 = scalar_lea.sflag (!%p129_p0), [#allocation3], %s537_s25  ;;  %s138_s29 = scalar_lea.vmem (!%p129_p0), [#allocation2], %s273_s26 }
  0x33   : > { %399 = dma.done.wait (%p598_p6), %s135_s27, 128  }
  0x34   : > { %401 = vsyncadd (%p598_p6), %s135_s27, 4294967168  ;;  %vm160_vm0 = vcmask 261120   ;;  %v159_v0 = vld [vmem:[%s138_s29] sm:$0xff]  ;;  %s277_s30 = sshll.u32 %s460_s13, 7  ;;  %s158_s3 = scalar_lea.vmem [#allocation5], %s273_s26 }
  0x35   : > { %v161_v1 = vsel %vm160_vm0, %v159_v0, 0.0  ;;  %v275_v11 = vld [vmem:[%s587_s1] ss:$0 sm:$0xff]  ;;  %s197_s4 = sshll.u32 %s158_s3, 4  ;;  %s195_s7 = scalar_lea.hbm %s588_s2, %s277_s30  ;;  %s198_s4 = int_to_ptr.vmem [resolvable:$true] %s197_s4 }
  0x36   : > { %162 = vadd.xlane.f32.xlu0 %v161_v1  ;;  %s184_s8 = scalar_lea.sflag [#allocation4], %s537_s25  ;;  %s356_s14 = scalar_lea.vmem %s198_s4, 128 }
  0x37   : > { %p357_p11 = scmp.ne.s32.totalorder %s198_s4, %s356_s14  ;;  %p599_p12 = scmp.ne.s32.totalorder %s593_s21, 0 }
  0x38   : > { %s423_s16 = smov [#allocation5]  }
  0x39   : > { %p358_p13 = pnand %p357_p11, %p599_p12  ;;  %s360_s17 = sshll.u32 %s423_s16, 4  ;;  %s361_s17 = int_to_ptr.vmem [resolvable:$false] %s360_s17 }
  0x3a   : > { %s362_s13 = scalar_lea.vmem %s361_s17, 256  ;;  %p363_p3 = scmp.lt.s32.totalorder %s198_s4, %s361_s17 }
  0x3b   : > { %p359_p1 = pneg %p358_p13  ;;  %p364_p5 = scmp.lt.s32.totalorder %s362_s13, %s356_s14 }
  0x3d   : > { %p365_p8 = por %p364_p5, %p363_p3 }
  0x3f   : > { %p366_p10 = pnand %p365_p8, %p359_p1 }
  0xbf   : > { %v163_v2 = vpop.xlane.xlu0 %162 }
  0xc0   : > { %v164_v3 = vmul.f32 0.03125, %v163_v2 }
  0xc2   : > { %v165_v4 = vsub.f32 %v159_v0, %v164_v3 }
  0xc4   : > { %v166_v5 = vmul.f32 %v165_v4, %v165_v4 }
  0xc6   : > { %v167_v6 = vsel %vm160_vm0, %v166_v5, 0.0 }
  0xc7   : > { %168 = vadd.xlane.f32.xlu0 %v167_v6 }
 0x150   : > { %v169_v7 = vpop.xlane.xlu0 %168 }
 0x151   : > { %v170_v8 = vmul.f32 0.03125, %v169_v7 }
 0x153   : > { %v171_v9 = vadd.f32 1e-05, %v170_v8 }
 0x155   : > { %326 = vrsqrt.f32 %v171_v9 }
 0x162   : > { %v327_v10 = vpop.eup %326 }
 0x163   : > { %v173_v12 = vmul.f32 %v327_v10, %v165_v4 }
 0x165   : > { %v181_v13 = vmul.f32 %v275_v11, %v173_v12 }
 0x167   : > { %182 = vst.msk [vmem:[%s158_s3] sm:$0xff] %vm160_vm0, %v181_v13 }
 0x168   : > { %369 = shalt.err (!%p366_p10)
}
 0x169   : > { %s370_s19 = scalar_lea.hbm %s195_s7, 128  ;;  %s374_s25 = scalar_lea.hbm %s588_s2, 256 }
 0x16a   : > { %p371_p2 = scmp.ne.s32.totalorder %s195_s7, %s370_s19  ;;  %p375_p7 = scmp.lt.s32.totalorder %s195_s7, %s588_s2 }
 0x16b   : > { %p376_p0 = scmp.lt.s32.totalorder %s374_s25, %s370_s19 }
 0x16c   : > { %p372_p4 = pnand %p371_p2, %p599_p12 }
 0x16d   : > { %p377_p6 = por %p376_p0, %p375_p7 }
 0x16e   : > { %p373_p9 = pneg %p372_p4 }
 0x170   : > { %p378_p11 = pnand %p377_p6, %p373_p9 }
 0x172   : > { %381 = shalt.err (!%p378_p11)
}
 0x173   : > { %282 = dma.vmem_to_hbm [thread:$0]  (%p599_p12), %s198_s4, 128, %s195_s7, %s184_s8  }
 0x174 PF: > { %s209_s29 = sand.u32 1, %s408_s9   ;;  %p600_p13 = scmp.ne.s32.totalorder %s594_s22, 0 }
 0x175   : > { %p601_p1 = scmp.ge.s32.totalorder %s420_s12, 2  ;;  %s210_s20 = scalar_lea.sflag [#allocation4], %s209_s29 }
 0x177   : > { %p289_p3 = pnand %p601_p1, %p600_p13 }
 0x179   : > { %p290_p5 = pneg %p289_p3 }
 0x17b   : > { %403 = dma.done.wait (%p290_p5), %s210_s20, 128  }
 0x17c   : > { %405 = vsyncadd (%p290_p5), %s210_s20, 4294967168  ;;  %p15_p8 = scmp.ge.s32.totalorder %s464_s15, 4   ;;  %s602_s9 = smov %s412_s10 }
 0x17d   : > { %s603_s10 = smov %s416_s11  ;;  %s604_s11 = smov %s476_s18 }
 0x17e   : > { %s605_s12 = smov %s464_s15  ;;  %17 = sbr.rel (!%p15_p8) target bundleno = 5 (0x5), region = 73 }
 0x183   :  { %215 = vsyncpa [#allocation3], 1 }
 0x184   :  { %217 = vsyncpa [#allocation3 + $0x1], 1 }
 0x185   :  { %218 = vsyncpa [#allocation4], 1 }
 0x186   :  { %220 = vsyncpa [#allocation4 + $0x1], 1 }

</bundles_post_ra>
